<compile_context>
chip_gen: v6e
topology: v6e:2x2x1
jax: 0.10.0
libtpu: 0.0.40
codegen_flags: <defaults>
</compile_context>

<pallas_src>
import numpy as np
import jax
import jax.numpy as jnp
from jax.experimental import pallas as pl
from jax.experimental.pallas import tpu as pltpu

# TODO(synk): `lrmul` is referenced but never defined in the original module;
# StyleGAN's equalized-LR default is 1.0, which is what we use here.
LRMUL = 1.0


def _round_up(x, m):
    return ((x + m - 1) // m) * m


def _pick_tile(total_aligned, cap, step):
    """Largest multiple of `step` that is <= cap and divides total_aligned."""
    t = max(step, min(total_aligned, cap))
    t -= t % step
    while total_aligned % t:
        t -= step
    return t


def plan_wscaled_linear(batch, in_channels, out_channels):
    """Choose tile sizes / padded shapes once per (B, Cin, Cout) configuration."""
    Bp0 = _round_up(batch, 16)            # bf16 sublane tile is (16, 128)
    Cinp0 = _round_up(in_channels, 128)   # lane-dense contraction dim
    Coutp0 = _round_up(out_channels, 128)  # lane-dense output dim

    tm = _pick_tile(Bp0, 512, 16)
    tk = _pick_tile(Cinp0, 1024, 128)
    tn = _pick_tile(Coutp0, 1024, 128)

    # v7x has 2 TensorCores: if both "parallel" grid axes collapse to one program
    # (skinny batch + single output tile), split the output-channel axis so the
    # j axis can shard across cores.  No-op on v5e/v6e (1 TC per chip).
    if Bp0 // tm == 1 and Coutp0 // tn == 1 and Coutp0 >= 256:
        tn = _pick_tile(Coutp0, Coutp0 // 2, 128)

    return dict(
        B=batch, Cin=in_channels, Cout=out_channels,
        Bp=_round_up(batch, tm),
        Cinp=_round_up(in_channels, tk),
        Coutp=_round_up(out_channels, tn),
        tm=tm, tn=tn, tk=tk,
    )


def prepare_wscaled_linear(weight, bias, c, plan):
    """One-time weight prep (off the per-call path):
       fold c into W, transpose to (Cin, Cout), zero-pad to tile multiples,
       cast to bf16; pad bias and reshape to a (1, Coutp) f32 row."""
    Cin, Cout = plan["Cin"], plan["Cout"]
    Cinp, Coutp = plan["Cinp"], plan["Coutp"]

    w_t = (jnp.asarray(weight, jnp.float32) * jnp.asarray(c, jnp.float32)).T  # (Cin, Cout)
    w_t = jnp.pad(w_t, ((0, Cinp - Cin), (0, Coutp - Cout))).astype(jnp.bfloat16)

    b2 = jnp.pad(jnp.asarray(bias, jnp.float32), (0, Coutp - Cout)).reshape(1, Coutp)
    return w_t, b2


def _wscaled_linear_kernel(x_ref, w_ref, b_ref, o_ref):
    # x_ref: (tm, tk) bf16   activation tile (zero-padded along K)
    # w_ref: (tk, tn) bf16   weight tile in (Cin, Cout) layout, c already folded in
    # b_ref: (1,  tn) f32    bias tile
    # o_ref: (tm, tn) f32    output tile; its block index is k-invariant, so it
    #                        stays resident in VMEM across the K loop and serves
    #                        directly as the f32 accumulator (no scratch, no copy).
    k = pl.program_id(2)

    @pl.when(k == 0)
    def _():
        o_ref[...] = jnp.zeros_like(o_ref)

    # bf16 x bf16 -> f32 on the MXU.
    o_ref[...] += jnp.dot(x_ref[...], w_ref[...], preferred_element_type=jnp.float32)

    @pl.when(k == pl.num_programs(2) - 1)
    def _():
        o_ref[...] += b_ref[...]


def wscaled_linear_forward(x, w_prepped, bias2, plan):
    """x: (B, Cin) f32; w_prepped: (Cinp, Coutp) bf16; bias2: (1, Coutp) f32."""
    B, Cin = x.shape
    assert (B, Cin) == (plan["B"], plan["Cin"])
    Bp, Cinp, Coutp = plan["Bp"], plan["Cinp"], plan["Coutp"]
    tm, tn, tk = plan["tm"], plan["tn"], plan["tk"]

    # Only x is touched per call: cast to bf16 and zero-pad to tile multiples.
    xb = jnp.asarray(x, jnp.float32).astype(jnp.bfloat16)
    if (Bp, Cinp) != (B, Cin):
        xb = jnp.pad(xb, ((0, Bp - B), (0, Cinp - Cin)))

    grid = (Bp // tm, Coutp // tn, Cinp // tk)

    out = pl.pallas_call(
        _wscaled_linear_kernel,
        out_shape=jax.ShapeDtypeStruct((Bp, Coutp), jnp.float32),
        grid_spec=pltpu.PrefetchScalarGridSpec(
            num_scalar_prefetch=0,
            grid=grid,
            in_specs=[
                pl.BlockSpec((tm, tk), lambda i, j, k: (i, k)),   # x
                pl.BlockSpec((tk, tn), lambda i, j, k: (k, j)),   # W (Cin, Cout)
                pl.BlockSpec((1, tn), lambda i, j, k: (0, j)),    # bias row
            ],
            out_specs=pl.BlockSpec((tm, tn), lambda i, j, k: (i, j)),
        ),
        compiler_params=pltpu.CompilerParams(
            dimension_semantics=("parallel", "parallel", "arbitrary"),
        ),
        cost_estimate=pl.CostEstimate(
            flops=2 * Bp * Cinp * Coutp,
            transcendentals=0,
            bytes_accessed=2 * (Bp * Cinp + Cinp * Coutp) + 4 * (Bp * Coutp + Coutp),
        ),
    )(xb, w_prepped, bias2)

    # Strip padding back to the caller's shape.
    if (Bp, Coutp) != (B, plan["Cout"]):
        out = out[:B, :plan["Cout"]]
    return out


def init_wscaled_linear_params(key, in_channels, out_channels):
    """Deterministic re-implementation of the module's __init__ (kaiming init)."""
    # kaiming_normal_ with a = calculate_gain('linear')/lrmul = 1.0:
    #   gain = sqrt(2 / (1 + a^2)) = 1.0, std = gain / sqrt(fan_in)
    a = 1.0 / LRMUL
    gain = np.sqrt(2.0 / (1.0 + a * a))
    std = gain / np.sqrt(in_channels)
    w_init = jax.random.normal(key, (out_channels, in_channels), jnp.float32) * std
    c = jnp.sqrt(jnp.mean(w_init ** 2))          # scalar, as in the module
    weight = w_init / (c / LRMUL)                # weight renormalization
    bias = jnp.zeros((out_channels,), jnp.float32)
    return weight, bias, c


if __name__ == "__main__":
    batch, in_channels, out_channels = 8, 32, 64

    key = jax.random.PRNGKey(0)
    kw, kx = jax.random.split(key)

    weight, bias, c = init_wscaled_linear_params(kw, in_channels, out_channels)
    x = jax.random.normal(kx, (batch, in_channels), jnp.float32)

    plan = plan_wscaled_linear(batch, in_channels, out_channels)
    w_prepped, bias2 = prepare_wscaled_linear(weight, bias, c, plan)

    y = wscaled_linear_forward(x, w_prepped, bias2, plan)
    y = jax.block_until_ready(y)

    # Tight check: same bf16-quantized operands, f32 math (matches kernel numerics).
    xq = x.astype(jnp.bfloat16).astype(jnp.float32)
    wq = w_prepped[:in_channels, :out_channels].astype(jnp.float32)
    y_ref_q = xq @ wq + bias[None, :]
    np.testing.assert_allclose(np.asarray(y), np.asarray(y_ref_q), rtol=1e-4, atol=1e-4)

    # Loose check against the full-precision module math: y = (x*c) @ W.T + b.
    y_ref = (x * c) @ weight.T + bias[None, :]
    np.testing.assert_allclose(np.asarray(y), np.asarray(y_ref), rtol=5e-2, atol=5e-2)

    print("KERNEL_OK")
</pallas_src>

<mosaic_0001>
module attributes {stable_mosaic.version = 11 : i64} {
  func.func @_wscaled_linear_kernel(%arg0: i32, %arg1: i32, %arg2: i32, %arg3: memref<16x128xbf16, #tpu.memory_space<vmem>>, %arg4: memref<128x128xbf16, #tpu.memory_space<vmem>>, %arg5: memref<1x128xf32, #tpu.memory_space<vmem>>, %arg6: memref<16x128xf32, #tpu.memory_space<vmem>>) attributes {dimension_semantics = [#tpu.dimension_semantics<parallel>, #tpu.dimension_semantics<parallel>, #tpu.dimension_semantics<arbitrary>], iteration_bounds = array<i64: 1, 1, 1>, scalar_prefetch = 0 : i64, scratch_operands = 0 : i64, tpu.core_type = #tpu.core_type<tc>, window_params = [{transform_indices = @transform_0, window_bounds = array<i64: 16, 128>}, {transform_indices = @transform_1, window_bounds = array<i64: 128, 128>}, {transform_indices = @transform_2, window_bounds = array<i64: 1, 128>}, {transform_indices = @transform_3, window_bounds = array<i64: 16, 128>}]} {
    %c0_i32 = arith.constant 0 : i32
    %0 = arith.cmpi eq, %arg2, %c0_i32 : i32
    %1 = arith.extui %0 : i1 to i32
    %c0_i32_0 = arith.constant 0 : i32
    %2 = arith.cmpi ne, %1, %c0_i32_0 : i32
    scf.if %2 {
      %cst_10 = arith.constant 0.000000e+00 : f32
      %12 = vector.broadcast %cst_10 : f32 to vector<16x128xf32>
      %c0_11 = arith.constant 0 : index
      %c0_12 = arith.constant 0 : index
      %13 = vector.load %arg6[%c0_11, %c0_12] : memref<16x128xf32, #tpu.memory_space<vmem>>, vector<16x128xf32>
      tpu.vector_store %arg6[%c0_11, %c0_12], %12 {strides = array<i32>} : memref<16x128xf32, #tpu.memory_space<vmem>>, vector<16x128xf32>,
    } else {
    }
    %c0 = arith.constant 0 : index
    %c0_1 = arith.constant 0 : index
    %3 = vector.load %arg6[%c0, %c0_1] : memref<16x128xf32, #tpu.memory_space<vmem>>, vector<16x128xf32>
    %c0_2 = arith.constant 0 : index
    %c0_3 = arith.constant 0 : index
    %4 = vector.load %arg3[%c0_2, %c0_3] : memref<16x128xbf16, #tpu.memory_space<vmem>>, vector<16x128xbf16>
    %c0_4 = arith.constant 0 : index
    %c0_5 = arith.constant 0 : index
    %5 = vector.load %arg4[%c0_4, %c0_5] : memref<128x128xbf16, #tpu.memory_space<vmem>>, vector<128x128xbf16>
    %cst = arith.constant dense<0.000000e+00> : vector<16x128xf32>
    %6 = tpu.matmul %4, %5, %cst {dimension_numbers = #tpu.dot_dimension_numbers<[1], [0], [0], [1], [0, 0, 1, 1], [], []>} : vector<16x128xbf16>, vector<128x128xbf16>, vector<16x128xf32> -> vector<16x128xf32>
    %7 = arith.addf %3, %6 : vector<16x128xf32>
    %c0_6 = arith.constant 0 : index
    %c0_7 = arith.constant 0 : index
    %8 = vector.load %arg6[%c0_6, %c0_7] : memref<16x128xf32, #tpu.memory_space<vmem>>, vector<16x128xf32>
    tpu.vector_store %arg6[%c0_6, %c0_7], %7 {strides = array<i32>} : memref<16x128xf32, #tpu.memory_space<vmem>>, vector<16x128xf32>,
    %c0_i32_8 = arith.constant 0 : i32
    %9 = arith.cmpi eq, %arg2, %c0_i32_8 : i32
    %10 = arith.extui %9 : i1 to i32
    %c0_i32_9 = arith.constant 0 : i32
    %11 = arith.cmpi ne, %10, %c0_i32_9 : i32
    scf.if %11 {
      %c0_10 = arith.constant 0 : index
      %c0_11 = arith.constant 0 : index
      %12 = vector.load %arg6[%c0_10, %c0_11] : memref<16x128xf32, #tpu.memory_space<vmem>>, vector<16x128xf32>
      %c0_12 = arith.constant 0 : index
      %c0_13 = arith.constant 0 : index
      %13 = vector.load %arg5[%c0_12, %c0_13] : memref<1x128xf32, #tpu.memory_space<vmem>>, vector<1x128xf32>
      %14 = vector.broadcast %13 : vector<1x128xf32> to vector<16x128xf32>
      %15 = arith.addf %12, %14 : vector<16x128xf32>
      %c0_14 = arith.constant 0 : index
      %c0_15 = arith.constant 0 : index
      %16 = vector.load %arg6[%c0_14, %c0_15] : memref<16x128xf32, #tpu.memory_space<vmem>>, vector<16x128xf32>
      tpu.vector_store %arg6[%c0_14, %c0_15], %15 {strides = array<i32>} : memref<16x128xf32, #tpu.memory_space<vmem>>, vector<16x128xf32>,
    } else {
    }
    return
  }
  func.func @transform_0(%arg0: i32, %arg1: i32, %arg2: i32) -> (i32, i32) {
    %c0_i32 = arith.constant 0 : i32
    return %arg0, %arg2 : i32, i32
  }
  func.func @transform_1(%arg0: i32, %arg1: i32, %arg2: i32) -> (i32, i32) {
    %c0_i32 = arith.constant 0 : i32
    return %arg2, %arg1 : i32, i32
  }
  func.func @transform_2(%arg0: i32, %arg1: i32, %arg2: i32) -> (i32, i32) {
    %c0_i32 = arith.constant 0 : i32
    %c0_i32_0 = arith.constant 0 : i32
    return %c0_i32, %arg1 : i32, i32
  }
  func.func @transform_3(%arg0: i32, %arg1: i32, %arg2: i32) -> (i32, i32) {
    %c0_i32 = arith.constant 0 : i32
    return %arg0, %arg1 : i32, i32
  }
}

</mosaic_0001>

<bundles_post_ra>
// kernel: tpu_custom_call.1
= control target key start
LH: loop header
LB: loop body
LE: loop exit
PB: predicated region body
PF: predicated region fallthrough
CT: control target
= control target key end

     0   :  { %8 = vsyncpa [#allocation3], 0  ;;  %s367_s0 = inlined_call_operand.hbm [shape: bf16[16,128], index: 0, kind: input, shape index: {}]   ;;  %s368_s1 = inlined_call_operand.hbm [shape: bf16[128,128], index: 1, kind: input, shape index: {}]   ;;  %s369_s2 = inlined_call_operand.vmem [shape: f32[1,128], index: 2, kind: input, shape index: {}]   ;;  %s370_s3 = inlined_call_operand.hbm [shape: f32[16,128], index: 3, kind: output, shape index: {}]  }
   0x1   :  { %9 = vsyncpa [#allocation6], 0 }
   0x2   :  { %10 = vsyncpa [#allocation4], 0  ;;  %s326_s12 = smov [#allocation2]  }
   0x3   :  { %s16_s13 = sshll.u32 %s326_s12, 4  ;;  %s17_s13 = int_to_ptr.vmem [resolvable:$true] %s16_s13 }
   0x4   :  { %s268_s14 = scalar_lea.vmem %s17_s13, 128  ;;  %p273_p1 = scmp.lt.s32.totalorder %s17_s13, %s17_s13 }
   0x5   :  { %p269_p0 = scmp.ne.s32.totalorder %s17_s13, %s268_s14  ;;  %p274_p2 = scmp.lt.s32.totalorder %s268_s14, %s268_s14 }
   0x7   :  { %p275_p3 = por %p274_p2, %p273_p1 }
   0x9   :  { %p276_p4 = pnand %p275_p3, %p269_p0 }
   0xb   :  { %279 = shalt.err (!%p276_p4)
}
   0xc   :  { %s327_s15 = smov 64   ;;  %s328_s16 = smov 4  }
   0xd   :  { %22 = dma.hbm_to_vmem [thread:$0]  %s367_s0, 128, %s17_s13, [#allocation3], %s327_s15, %s327_s15, %s328_s16  }
   0xe   :  { %s329_s19 = smov [#allocation5]  }
   0xf   :  { %s28_s20 = sshll.u32 %s329_s19, 4  ;;  %s29_s20 = int_to_ptr.vmem [resolvable:$true] %s28_s20 }
  0x10   :  { %s288_s21 = scalar_lea.vmem %s29_s20, 1024  ;;  %p293_p6 = scmp.lt.s32.totalorder %s29_s20, %s29_s20 }
  0x11   :  { %p289_p5 = scmp.ne.s32.totalorder %s29_s20, %s288_s21  ;;  %p294_p7 = scmp.lt.s32.totalorder %s288_s21, %s288_s21 }
  0x13   :  { %p295_p8 = por %p294_p7, %p293_p6 }
  0x15   :  { %p296_p9 = pnand %p295_p8, %p289_p5 }
  0x17   :  { %299 = shalt.err (!%p296_p9)
}
  0x18   :  { %34 = dma.hbm_to_vmem [thread:$0]  %s368_s1, 1024, %s29_s20, [#allocation6], %s327_s15, %s327_s15, %s328_s16  }
  0x19   :  { %320 = dma.done.wait [#allocation3], 128  }
  0x1a   :  { %321 = vsyncadd [#allocation3], 4294967168 }
  0x1b   :  { %322 = dma.done.wait [#allocation6], 1024  }
  0x1c   :  { %323 = vsyncadd [#allocation6], 4294966272  ;;  %v330_v0 = vmov 0.0   ;;  %vm331_vm0 = vmmov 0   ;;  %v251_v1 = vld [vmem:[#allocation5 + $0x38] sm:$0xff]   ;;  %v252_v2 = vld [vmem:[#allocation5 + $0x30] sm:$0xff]  }
  0x1d   :  { %222 = vmatprep.subr.bf16.mxu0 %v330_v0  ;;  %238 = vmatprep.mubr.msk.bf16.mxu0 %vm331_vm0, %v330_v0  ;;  %v253_v3 = vld [vmem:[#allocation5 + $0x28] sm:$0xff]   ;;  %v254_v4 = vld [vmem:[#allocation5 + $0x20] sm:$0xff]   ;;  %v255_v5 = vld [vmem:[#allocation5 + $0x18] sm:$0xff]   ;;  %s332_s24 = smov [#allocation7]  }
  0x1e   :  { %223 = vmatpush3.bf16.msra.mxu0 %v251_v1  ;;  %v256_v6 = vld [vmem:[#allocation5 + $0x10] sm:$0xff]   ;;  %v257_v7 = vld [vmem:[#allocation5 + $0x8] sm:$0xff]   ;;  %v258_v8 = vld [vmem:[#allocation5] sm:$0xff]   ;;  %s190_s25 = sshll.u32 %s332_s24, 4  ;;  %s191_s25 = int_to_ptr.vmem [resolvable:$true] %s190_s25 }
  0x1f   :  { %224 = vmatprep.subr.bf16.mxu0 %v330_v0  ;;  %v259_v9 = vld [vmem:[#allocation2] sm:$0xff]   ;;  %s300_s26 = scalar_lea.vmem %s191_s25, 256  ;;  %p305_p11 = scmp.lt.s32.totalorder %s191_s25, %s191_s25 }
  0x20   :  { %v212_v11 = vld [vmem:[%s369_s2] ss:$0 sm:$0xff]  ;;  %p301_p10 = scmp.ne.s32.totalorder %s191_s25, %s300_s26  ;;  %p306_p12 = scmp.lt.s32.totalorder %s300_s26, %s300_s26 }
  0x22   :  { %225 = vmatpush3.bf16.msra.mxu0 %v252_v2  ;;  %p307_p13 = por %p306_p12, %p305_p11 }
  0x23   :  { %226 = vmatprep.subr.bf16.mxu0 %v330_v0 }
  0x24   :  { %p308_p0 = pnand %p307_p13, %p301_p10 }
  0x26   :  { %227 = vmatpush3.bf16.msra.mxu0 %v253_v3 }
  0x27   :  { %228 = vmatprep.subr.bf16.mxu0 %v330_v0 }
  0x2a   :  { %229 = vmatpush3.bf16.msra.mxu0 %v254_v4 }
  0x2b   :  { %230 = vmatprep.subr.bf16.mxu0 %v330_v0 }
  0x2e   :  { %231 = vmatpush3.bf16.msra.mxu0 %v255_v5 }
  0x2f   :  { %232 = vmatprep.subr.bf16.mxu0 %v330_v0 }
  0x32   :  { %233 = vmatpush3.bf16.msra.mxu0 %v256_v6 }
  0x33   :  { %234 = vmatprep.subr.bf16.mxu0 %v330_v0 }
  0x36   :  { %235 = vmatpush3.bf16.msra.mxu0 %v257_v7 }
  0x37   :  { %236 = vmatprep.subr.bf16.mxu0 %v330_v0 }
  0x3a   :  { %237 = vmatpush3.bf16.msra.mxu0 %v258_v8 }
  0x3d   :  { %239 = vmatmul.mubr.bf16.vlgmr.msra.gmra.mxu0 %v259_v9 }
  0xfd   :  { %v158_v10 = vpop.f32.mrf.mxu0 }
  0xfe   :  { %v181_v13 = vadd.f32 %v212_v11, %v158_v10 }
  0xff   :  { %v240_v12 = vpop.f32.mrf.mxu0 }
 0x100   :  { %183 = vst [vmem:[#allocation7] sm:$0xff] %v181_v13 }
 0x101   :  { %v161_v14 = vpop.f32.mrf.mxu0 }
 0x102   :  { %v182_v16 = vadd.f32 %v212_v11, %v161_v14 }
 0x103   :  { %v241_v15 = vpop.f32.mrf.mxu0 }
 0x104   :  { %184 = vst [vmem:[#allocation7 + $0x8] sm:$0xff] %v182_v16 }
 0x105   :  { %311 = shalt.err (!%p308_p0)
}
 0x106   :  { %s333_s27 = smov 128   ;;  %s334_s28 = smov 8  }
 0x107   :  { %196 = dma.vmem_to_hbm [thread:$0]  %s191_s25, 256, %s370_s3, [#allocation4], %s333_s27, %s333_s27, %s334_s28  }
 0x108   :  { %324 = dma.done.wait [#allocation4], 256  }
 0x109   :  { %325 = vsyncadd [#allocation4], 4294967040 }
 0x10a   :  { %200 = vsyncpa [#allocation3], 1 }
 0x10b   :  { %201 = vsyncpa [#allocation6], 1 }
 0x10c   :  { %202 = vsyncpa [#allocation4], 1 }

</bundles_post_ra>
